<compile_context>
chip_gen: v6e
topology: v6e:2x2x1
jax: 0.10.0
libtpu: 0.0.40
codegen_flags: <defaults>
</compile_context>

<pallas_src>
import math

import jax
import jax.numpy as jnp
from jax.experimental import pallas as pl
from jax.experimental.pallas import tpu as pltpu

# Module constants from STC.__init__ (con_size=40, temporal kernel 25, pool 51/5).
_CON_SIZE = 40
_K_TIME = 25
_POOL = 51
_POOL_STRIDE = 5
_BN_EPS = 1e-5
_TARGET_BBLK = 32        # samples per grid step; 32*W rows keeps v7x (64 MiB VMEM) happy,
                         # can be raised to 64 on v5e/v6e (128 MiB VMEM).


def _elu(x):
    # ELU(alpha=1); exp argument clamped at 0 so the untaken branch never overflows.
    return jnp.where(x > 0.0, x, jnp.exp(jnp.minimum(x, 0.0)) - 1.0)


def _stc_kernel(p_ref, wc_ref, b1_ref, w2_ref, b2_ref, w3_ref, b3_ref, o_ref, acc_ref):
    """One batch block (M = Bblk*W rows).

    p_ref  : (C, M, 75)    per-channel stride-5 temporal windows (im2col'd)
    wc_ref : (75, 40)      fused temporal taps (conv(1,25)+avgpool+BN1 folded)
    b1_ref : (1, 40)       conv1 bias + BN1 shift
    w2_ref : (C, 40, 40)   spatial conv (C,1) weights with BN2 scale folded
    b2_ref : (1, 40)       conv2 bias + BN2 shift
    w3_ref : (40, 40)      1x1 projection
    b3_ref : (1, 40)
    acc_ref: (M, 40) f32   VMEM accumulator for the electrode-channel reduction
    """
    C = p_ref.shape[0]
    wc = wc_ref[...]
    b1 = b1_ref[...]

    acc_ref[...] = jnp.zeros_like(acc_ref)

    def body(c, carry):
        # Temporal conv+pool+BN1+ELU for channel c: one (M,75)x(75,40) MXU matmul;
        # bias add and ELU applied once on the whole (M,40) block (hoisted epilogue).
        h = _elu(jnp.dot(p_ref[c], wc, preferred_element_type=jnp.float32) + b1)
        # Spatial conv contribution of channel c, accumulated (K-chunked matmul).
        acc_ref[...] += jnp.dot(h, w2_ref[c], preferred_element_type=jnp.float32)
        return carry

    jax.lax.fori_loop(0, C, body, 0)

    h2 = _elu(acc_ref[...] + b2_ref[...])                 # BN2 folded + ELU
    # TODO(synk): Dropout(0.5) is identity here (eval forward); training-mode dropout
    # would need pltpu.prng_seed / prng_random_bits masking.
    out = jnp.dot(h2, w3_ref[...], preferred_element_type=jnp.float32) + b3_ref[...]
    o_ref[...] = out.astype(o_ref.dtype)


def _choose_bblk(batch, w_out, target=_TARGET_BBLK):
    # Smallest Bblk such that (Bblk * w_out) % 8 == 0 (sublane-aligned blocks),
    # rounded to the target, never (much) larger than the batch itself.
    base = 8 // math.gcd(w_out, 8)
    tgt = max(base, (target // base) * base)
    need = -(-batch // base) * base
    return min(tgt, need)


def stc_forward(x, params, *, bblk=None):
    """STC.forward (eval mode). x: (B, 1, C, T) float32 -> (B, W, 40)."""
    (w1, b1, g1, be1, m1, v1,
     w2, b2, g2, be2, m2, v2,
     w3, b3) = params
    B, _, C, T = x.shape
    E = w1.shape[0]
    KC = _K_TIME + _POOL - 1                                # 75 fused taps
    assert T >= KC, "need at least 75 time samples for conv(1,25)+pool(1,51)"
    # Floor division matches PyTorch: trailing samples that don't fill a window drop.
    W = (T - KC) // _POOL_STRIDE + 1

    f32 = jnp.float32
    # ---- fuse Conv2d(1,E,(1,25)) + AvgPool2d((1,51),(1,5)) + BatchNorm(eval) ----
    s1 = g1 / jnp.sqrt(v1 + _BN_EPS)                                     # (E,)
    w1f = w1.reshape(E, _K_TIME).astype(f32)                             # (E, 25)
    d = jnp.arange(KC)[:, None] - jnp.arange(_K_TIME)[None, :]           # (75, 25)
    pool_mat = ((d >= 0) & (d < _POOL)).astype(f32) / _POOL              # conv * box/51
    wc_eff = (pool_mat @ w1f.T) * s1[None, :]                            # (75, E)
    b1_eff = ((b1 - m1) * s1 + be1).reshape(1, E).astype(f32)

    # ---- fold BatchNorm(eval) into spatial Conv2d(E,E,(C,1)) ---------------------
    s2 = g2 / jnp.sqrt(v2 + _BN_EPS)
    w2_eff = (jnp.transpose(w2[:, :, :, 0], (2, 1, 0))
              * s2[None, None, :]).astype(f32)                           # (C, E_in, E_out)
    b2_eff = ((b2 - m2) * s2 + be2).reshape(1, E).astype(f32)

    # ---- projection Conv2d(E,E,(1,1)) --------------------------------------------
    w3_eff = w3[:, :, 0, 0].T.astype(f32)                                # (E_in, E_out)
    b3_eff = b3.reshape(1, E).astype(f32)

    # ---- batch blocking -----------------------------------------------------------
    if bblk is None:
        bblk = _choose_bblk(B, W)
    n_steps = -(-B // bblk)
    Bpad = n_steps * bblk
    Mblk = bblk * W

    # ---- im2col: 75 static strided slices (no XLA gather), layout (C, Bpad*W, 75) --
    x2 = x[:, 0].astype(f32)                                             # (B, C, T)
    if Bpad > B:
        x2 = jnp.concatenate([x2, jnp.zeros((Bpad - B, C, T), f32)], axis=0)
    xt = jnp.transpose(x2, (1, 0, 2))                                    # (C, Bpad, T)
    stop = _POOL_STRIDE * (W - 1) + 1
    cols = [xt[:, :, k:k + stop:_POOL_STRIDE] for k in range(KC)]        # (C,Bpad,W) each
    patches = jnp.stack(cols, axis=-1).reshape(C, Bpad * W, KC)          # (C, Bpad*W, 75)
    # TODO(synk): casting patches/weights to bf16 (f32 accumulation) would halve the
    # im2col HBM stream (matters most on v5e) at a small accuracy cost.

    flops = Bpad * W * (2 * C * KC * E + 2 * C * E * E + 2 * E * E)
    transc = Bpad * W * E * (C + 1)
    bytes_acc = 4 * (C * Bpad * W * KC + KC * E + C * E * E + E * E + 4 * E + Bpad * W * E)

    # VMEM budget: patches tile (75->128 lanes) x2 buffers + lane-padded weights +
    # out/acc tiles + headroom; capped below v7x's 64 MiB physical VMEM.
    lane = 128
    vmem_need = (2 * C * Mblk * lane          # patches double buffer
                 + 2 * C * E * lane           # w2
                 + 3 * Mblk * lane            # out double buffer + acc scratch
                 + 2 * (KC + 4) * lane) * 4 + (2 << 20)
    vmem_limit = int(min(48 * 2**20, max(vmem_need * 3 // 2, 24 * 2**20)))

    out_flat = pl.pallas_call(
        _stc_kernel,
        out_shape=jax.ShapeDtypeStruct((Bpad * W, E), x.dtype),
        grid_spec=pltpu.PrefetchScalarGridSpec(
            num_scalar_prefetch=0,
            grid=(n_steps,),
            in_specs=[
                pl.BlockSpec((C, Mblk, KC), lambda i: (0, i, 0)),   # per-block patches
                pl.BlockSpec((KC, E), lambda i: (0, 0)),            # fused temporal taps
                pl.BlockSpec((1, E), lambda i: (0, 0)),             # bias1 (BN1 folded)
                pl.BlockSpec((C, E, E), lambda i: (0, 0, 0)),       # spatial conv (BN2 folded)
                pl.BlockSpec((1, E), lambda i: (0, 0)),             # bias2
                pl.BlockSpec((E, E), lambda i: (0, 0)),             # 1x1 projection
                pl.BlockSpec((1, E), lambda i: (0, 0)),             # bias3
            ],
            out_specs=pl.BlockSpec((Mblk, E), lambda i: (i, 0)),    # dense (M, 40) store
            scratch_shapes=[pltpu.VMEM((Mblk, E), jnp.float32)],
        ),
        compiler_params=pltpu.CompilerParams(
            dimension_semantics=("parallel",),      # batch blocks shard across TCs
            vmem_limit_bytes=vmem_limit),
        cost_estimate=pl.CostEstimate(flops=flops, transcendentals=transc,
                                      bytes_accessed=bytes_acc),
    )(patches, wc_eff, b1_eff, w2_eff, b2_eff, w3_eff, b3_eff)

    return out_flat.reshape(Bpad, W, E)[:B]


def stc_reference(x, params):
    """Pure-JAX unfused reference (eval-mode BN, dropout = identity)."""
    (w1, b1, g1, be1, m1, v1,
     w2, b2, g2, be2, m2, v2,
     w3, b3) = params
    dn = ("NCHW", "OIHW", "NCHW")

    def bn(y, g, be, m, v):
        sh = (1, -1, 1, 1)
        return ((y - m.reshape(sh))
                * (g.reshape(sh) / jnp.sqrt(v.reshape(sh) + _BN_EPS)) + be.reshape(sh))

    y = jax.lax.conv_general_dilated(x, w1, (1, 1), "VALID", dimension_numbers=dn)
    y = y + b1.reshape(1, -1, 1, 1)
    y = jax.lax.reduce_window(y, 0.0, jax.lax.add,
                              (1, 1, 1, _POOL), (1, 1, 1, _POOL_STRIDE), "VALID") / _POOL
    y = _elu(bn(y, g1, be1, m1, v1))
    y = jax.lax.conv_general_dilated(y, w2, (1, 1), "VALID", dimension_numbers=dn)
    y = y + b2.reshape(1, -1, 1, 1)
    y = _elu(bn(y, g2, be2, m2, v2))
    # Dropout: identity in eval.
    y = jax.lax.conv_general_dilated(y, w3, (1, 1), "VALID", dimension_numbers=dn)
    y = y + b3.reshape(1, -1, 1, 1)
    B_, E_, H_, W_ = y.shape
    return jnp.transpose(y, (0, 2, 3, 1)).reshape(B_, H_ * W_, E_)


if __name__ == "__main__":
    # Small shapes consistent with the module: batch=2, n_channel=63 (default),
    # 100 time samples -> 6 pooled positions, con_size=40.
    B, C, T = 2, 63, 100
    E = _CON_SIZE
    key = jax.random.PRNGKey(0)
    keys = jax.random.split(key, 16)

    def uni(k, shape, bound):
        return jax.random.uniform(k, shape, jnp.float32, -bound, bound)

    x = jax.random.normal(keys[0], (B, 1, C, T), dtype=jnp.float32)

    # Conv2d(1, 40, (1,25))
    w1 = uni(keys[1], (E, 1, 1, _K_TIME), 1.0 / _K_TIME ** 0.5)
    b1 = uni(keys[2], (E,), 1.0 / _K_TIME ** 0.5)
    # BatchNorm2d(40) (eval-mode running stats + affine)
    g1 = 1.0 + 0.1 * jax.random.normal(keys[3], (E,), dtype=jnp.float32)
    be1 = 0.1 * jax.random.normal(keys[4], (E,), dtype=jnp.float32)
    m1 = 0.1 * jax.random.normal(keys[5], (E,), dtype=jnp.float32)
    v1 = 1.0 + 0.5 * jax.random.uniform(keys[6], (E,), dtype=jnp.float32)
    # Conv2d(40, 40, (C,1))
    w2 = uni(keys[7], (E, E, C, 1), 1.0 / (E * C) ** 0.5)
    b2 = uni(keys[8], (E,), 1.0 / (E * C) ** 0.5)
    # BatchNorm2d(40)
    g2 = 1.0 + 0.1 * jax.random.normal(keys[9], (E,), dtype=jnp.float32)
    be2 = 0.1 * jax.random.normal(keys[10], (E,), dtype=jnp.float32)
    m2 = 0.1 * jax.random.normal(keys[11], (E,), dtype=jnp.float32)
    v2 = 1.0 + 0.5 * jax.random.uniform(keys[12], (E,), dtype=jnp.float32)
    # projection Conv2d(40, 40, (1,1))
    w3 = uni(keys[13], (E, E, 1, 1), 1.0 / E ** 0.5)
    b3 = uni(keys[14], (E,), 1.0 / E ** 0.5)

    params = (w1, b1, g1, be1, m1, v1, w2, b2, g2, be2, m2, v2, w3, b3)

    out = jax.block_until_ready(jax.jit(stc_forward)(x, params))

    ref = stc_reference(x, params)
    W_out = (T - (_K_TIME + _POOL - 1)) // _POOL_STRIDE + 1
    assert out.shape == (B, W_out, E) and out.dtype == x.dtype
    err = float(jnp.max(jnp.abs(out - ref)))
    assert jnp.allclose(out, ref, atol=1e-3, rtol=1e-3), f"mismatch vs reference (max err {err})"

    print("KERNEL_OK")
</pallas_src>

<mosaic_0001>
module attributes {stable_mosaic.version = 11 : i64} {
  func.func @_stc_kernel(%arg0: i32, %arg1: memref<63x24x75xf32, #tpu.memory_space<vmem>>, %arg2: memref<75x40xf32, #tpu.memory_space<vmem>>, %arg3: memref<1x40xf32, #tpu.memory_space<vmem>>, %arg4: memref<63x40x40xf32, #tpu.memory_space<vmem>>, %arg5: memref<1x40xf32, #tpu.memory_space<vmem>>, %arg6: memref<40x40xf32, #tpu.memory_space<vmem>>, %arg7: memref<1x40xf32, #tpu.memory_space<vmem>>, %arg8: memref<24x40xf32, #tpu.memory_space<vmem>>, %arg9: memref<24x40xf32, #tpu.memory_space<vmem>>) attributes {dimension_semantics = [#tpu.dimension_semantics<parallel>], iteration_bounds = array<i64: 1>, scalar_prefetch = 0 : i64, scratch_operands = 1 : i64, tpu.core_type = #tpu.core_type<tc>, window_params = [{transform_indices = @transform_0, window_bounds = array<i64: 63, 24, 75>}, {pipeline_mode = #tpu.pipeline_mode<synchronous>, transform_indices = @transform_1, window_bounds = array<i64: 75, 40>}, {pipeline_mode = #tpu.pipeline_mode<synchronous>, transform_indices = @transform_2, window_bounds = array<i64: 1, 40>}, {pipeline_mode = #tpu.pipeline_mode<synchronous>, transform_indices = @transform_3, window_bounds = array<i64: 63, 40, 40>}, {pipeline_mode = #tpu.pipeline_mode<synchronous>, transform_indices = @transform_4, window_bounds = array<i64: 1, 40>}, {pipeline_mode = #tpu.pipeline_mode<synchronous>, transform_indices = @transform_5, window_bounds = array<i64: 40, 40>}, {pipeline_mode = #tpu.pipeline_mode<synchronous>, transform_indices = @transform_6, window_bounds = array<i64: 1, 40>}, {transform_indices = @transform_7, window_bounds = array<i64: 24, 40>}]} {
    %c0 = arith.constant 0 : index
    %c0_0 = arith.constant 0 : index
    %0 = vector.load %arg2[%c0, %c0_0] : memref<75x40xf32, #tpu.memory_space<vmem>>, vector<75x40xf32>
    %c0_1 = arith.constant 0 : index
    %c0_2 = arith.constant 0 : index
    %1 = vector.load %arg3[%c0_1, %c0_2] : memref<1x40xf32, #tpu.memory_space<vmem>>, vector<1x40xf32>
    %cst = arith.constant 0.000000e+00 : f32
    %2 = vector.broadcast %cst : f32 to vector<24x40xf32>
    %c0_3 = arith.constant 0 : index
    %c0_4 = arith.constant 0 : index
    %3 = vector.load %arg9[%c0_3, %c0_4] : memref<24x40xf32, #tpu.memory_space<vmem>>, vector<24x40xf32>
    tpu.vector_store %arg9[%c0_3, %c0_4], %2 {strides = array<i32>} : memref<24x40xf32, #tpu.memory_space<vmem>>, vector<24x40xf32>,
    %c0_i32 = arith.constant 0 : i32
    %c63_i32 = arith.constant 63 : i32
    %4 = arith.addi %c0_i32, %c63_i32 : i32
    %c1_i32 = arith.constant 1 : i32
    scf.for %arg10 = %c0_i32 to %4 step %c1_i32  : i32 {
      %23 = arith.index_cast %arg10 : i32 to index
      %c0_20 = arith.constant 0 : index
      %c0_21 = arith.constant 0 : index
      %24 = vector.load %arg1[%23, %c0_20, %c0_21] : memref<63x24x75xf32, #tpu.memory_space<vmem>>, vector<1x24x75xf32>
      %25 = vector.shape_cast %24 : vector<1x24x75xf32> to vector<24x75xf32>
      %cst_22 = arith.constant dense<0.000000e+00> : vector<24x40xf32>
      %26 = tpu.matmul %25, %0, %cst_22 {dimension_numbers = #tpu.dot_dimension_numbers<[1], [0], [0], [1], [0, 0, 1, 1], [], []>} : vector<24x75xf32>, vector<75x40xf32>, vector<24x40xf32> -> vector<24x40xf32>
      %27 = vector.broadcast %1 : vector<1x40xf32> to vector<24x40xf32>
      %28 = arith.addf %26, %27 : vector<24x40xf32>
      %cst_23 = arith.constant 0.000000e+00 : f32
      %29 = vector.broadcast %cst_23 : f32 to vector<24x40xf32>
      %30 = arith.cmpf ogt, %28, %29 : vector<24x40xf32>
      %cst_24 = arith.constant 0.000000e+00 : f32
      %31 = vector.broadcast %cst_24 : f32 to vector<24x40xf32>
      %32 = arith.minimumf %28, %31 : vector<24x40xf32>
      %33 = math.exp %32 : vector<24x40xf32>
      %cst_25 = arith.constant 1.000000e+00 : f32
      %34 = vector.broadcast %cst_25 : f32 to vector<24x40xf32>
      %35 = arith.subf %33, %34 : vector<24x40xf32>
      %36 = arith.select %30, %28, %35 : vector<24x40xi1>, vector<24x40xf32>
      %c0_26 = arith.constant 0 : index
      %c0_27 = arith.constant 0 : index
      %37 = vector.load %arg9[%c0_26, %c0_27] : memref<24x40xf32, #tpu.memory_space<vmem>>, vector<24x40xf32>
      %38 = arith.index_cast %arg10 : i32 to index
      %c0_28 = arith.constant 0 : index
      %c0_29 = arith.constant 0 : index
      %39 = vector.load %arg4[%38, %c0_28, %c0_29] : memref<63x40x40xf32, #tpu.memory_space<vmem>>, vector<1x40x40xf32>
      %40 = vector.shape_cast %39 : vector<1x40x40xf32> to vector<40x40xf32>
      %cst_30 = arith.constant dense<0.000000e+00> : vector<24x40xf32>
      %41 = tpu.matmul %36, %40, %cst_30 {dimension_numbers = #tpu.dot_dimension_numbers<[1], [0], [0], [1], [0, 0, 1, 1], [], []>} : vector<24x40xf32>, vector<40x40xf32>, vector<24x40xf32> -> vector<24x40xf32>
      %42 = arith.addf %37, %41 : vector<24x40xf32>
      %c0_31 = arith.constant 0 : index
      %c0_32 = arith.constant 0 : index
      %43 = vector.load %arg9[%c0_31, %c0_32] : memref<24x40xf32, #tpu.memory_space<vmem>>, vector<24x40xf32>
      tpu.vector_store %arg9[%c0_31, %c0_32], %42 {strides = array<i32>} : memref<24x40xf32, #tpu.memory_space<vmem>>, vector<24x40xf32>,
    }
    %c63_i32_5 = arith.constant 63 : i32
    %c0_6 = arith.constant 0 : index
    %c0_7 = arith.constant 0 : index
    %5 = vector.load %arg9[%c0_6, %c0_7] : memref<24x40xf32, #tpu.memory_space<vmem>>, vector<24x40xf32>
    %c0_8 = arith.constant 0 : index
    %c0_9 = arith.constant 0 : index
    %6 = vector.load %arg5[%c0_8, %c0_9] : memref<1x40xf32, #tpu.memory_space<vmem>>, vector<1x40xf32>
    %7 = vector.broadcast %6 : vector<1x40xf32> to vector<24x40xf32>
    %8 = arith.addf %5, %7 : vector<24x40xf32>
    %cst_10 = arith.constant 0.000000e+00 : f32
    %9 = vector.broadcast %cst_10 : f32 to vector<24x40xf32>
    %10 = arith.cmpf ogt, %8, %9 : vector<24x40xf32>
    %cst_11 = arith.constant 0.000000e+00 : f32
    %11 = vector.broadcast %cst_11 : f32 to vector<24x40xf32>
    %12 = arith.minimumf %8, %11 : vector<24x40xf32>
    %13 = math.exp %12 : vector<24x40xf32>
    %cst_12 = arith.constant 1.000000e+00 : f32
    %14 = vector.broadcast %cst_12 : f32 to vector<24x40xf32>
    %15 = arith.subf %13, %14 : vector<24x40xf32>
    %16 = arith.select %10, %8, %15 : vector<24x40xi1>, vector<24x40xf32>
    %c0_13 = arith.constant 0 : index
    %c0_14 = arith.constant 0 : index
    %17 = vector.load %arg6[%c0_13, %c0_14] : memref<40x40xf32, #tpu.memory_space<vmem>>, vector<40x40xf32>
    %cst_15 = arith.constant dense<0.000000e+00> : vector<24x40xf32>
    %18 = tpu.matmul %16, %17, %cst_15 {dimension_numbers = #tpu.dot_dimension_numbers<[1], [0], [0], [1], [0, 0, 1, 1], [], []>} : vector<24x40xf32>, vector<40x40xf32>, vector<24x40xf32> -> vector<24x40xf32>
    %c0_16 = arith.constant 0 : index
    %c0_17 = arith.constant 0 : index
    %19 = vector.load %arg7[%c0_16, %c0_17] : memref<1x40xf32, #tpu.memory_space<vmem>>, vector<1x40xf32>
    %20 = vector.broadcast %19 : vector<1x40xf32> to vector<24x40xf32>
    %21 = arith.addf %18, %20 : vector<24x40xf32>
    %c0_18 = arith.constant 0 : index
    %c0_19 = arith.constant 0 : index
    %22 = vector.load %arg8[%c0_18, %c0_19] : memref<24x40xf32, #tpu.memory_space<vmem>>, vector<24x40xf32>
    tpu.vector_store %arg8[%c0_18, %c0_19], %21 {strides = array<i32>} : memref<24x40xf32, #tpu.memory_space<vmem>>, vector<24x40xf32>,
    return
  }
  func.func @transform_0(%arg0: i32) -> (i32, i32, i32) {
    %c0_i32 = arith.constant 0 : i32
    %c0_i32_0 = arith.constant 0 : i32
    %c0_i32_1 = arith.constant 0 : i32
    return %c0_i32, %arg0, %c0_i32_0 : i32, i32, i32
  }
  func.func @transform_1(%arg0: i32) -> (i32, i32) {
    %c0_i32 = arith.constant 0 : i32
    %c0_i32_0 = arith.constant 0 : i32
    %c0_i32_1 = arith.constant 0 : i32
    return %c0_i32, %c0_i32_0 : i32, i32
  }
  func.func @transform_2(%arg0: i32) -> (i32, i32) {
    %c0_i32 = arith.constant 0 : i32
    %c0_i32_0 = arith.constant 0 : i32
    %c0_i32_1 = arith.constant 0 : i32
    return %c0_i32, %c0_i32_0 : i32, i32
  }
  func.func @transform_3(%arg0: i32) -> (i32, i32, i32) {
    %c0_i32 = arith.constant 0 : i32
    %c0_i32_0 = arith.constant 0 : i32
    %c0_i32_1 = arith.constant 0 : i32
    %c0_i32_2 = arith.constant 0 : i32
    return %c0_i32, %c0_i32_0, %c0_i32_1 : i32, i32, i32
  }
  func.func @transform_4(%arg0: i32) -> (i32, i32) {
    %c0_i32 = arith.constant 0 : i32
    %c0_i32_0 = arith.constant 0 : i32
    %c0_i32_1 = arith.constant 0 : i32
    return %c0_i32, %c0_i32_0 : i32, i32
  }
  func.func @transform_5(%arg0: i32) -> (i32, i32) {
    %c0_i32 = arith.constant 0 : i32
    %c0_i32_0 = arith.constant 0 : i32
    %c0_i32_1 = arith.constant 0 : i32
    return %c0_i32, %c0_i32_0 : i32, i32
  }
  func.func @transform_6(%arg0: i32) -> (i32, i32) {
    %c0_i32 = arith.constant 0 : i32
    %c0_i32_0 = arith.constant 0 : i32
    %c0_i32_1 = arith.constant 0 : i32
    return %c0_i32, %c0_i32_0 : i32, i32
  }
  func.func @transform_7(%arg0: i32) -> (i32, i32) {
    %c0_i32 = arith.constant 0 : i32
    %c0_i32_0 = arith.constant 0 : i32
    return %arg0, %c0_i32 : i32, i32
  }
}

</mosaic_0001>

<bundles_post_ra>
// kernel: stc_forward.1
= control target key start
LH: loop header
LB: loop body
LE: loop exit
PB: predicated region body
PF: predicated region fallthrough
CT: control target
= control target key end

     0   :  { %vm37_vm0 = vcmask 326656   ;;  %v580_v3 = vmov 0.0   ;;  %s685_s23 = smov 0   ;;  %s799_s0 = inlined_call_operand.vmem [shape: f32[63,24,75], index: 0, kind: input, shape index: {}]   ;;  %s800_s1 = inlined_call_operand.vmem [shape: f32[75,40], index: 1, kind: input, shape index: {}]   ;;  %s801_s3 = inlined_call_operand.vmem [shape: f32[63,40,40], index: 3, kind: input, shape index: {}]   ;;  %s802_s4 = inlined_call_operand.vmem [shape: f32[1,40], index: 4, kind: input, shape index: {}]   ;;  %s803_s5 = inlined_call_operand.vmem [shape: f32[40,40], index: 5, kind: input, shape index: {}]   ;;  %s804_s6 = inlined_call_operand.vmem [shape: f32[1,40], index: 6, kind: input, shape index: {}]   ;;  %s805_s7 = inlined_call_operand.vmem [shape: f32[24,40], index: 7, kind: output, shape index: {}]   ;;  %s806_s2 = inlined_call_operand.vmem [shape: f32[1,40], index: 2, kind: input, shape index: {}]  }
   0x1   :  { %v627_v0 = vld [vmem:[%s800_s1] sm:$0xff]  ;;  %v632_v1 = vld [vmem:[%s800_s1 + $0x8] sm:$0xff]  ;;  %v637_v2 = vld [vmem:[%s800_s1 + $0x10] sm:$0xff]  ;;  %38 = vst.msk [vmem:[#allocation2] sm:$0xff] %vm37_vm0, %v580_v3 }
   0x2   :  { %39 = vst.msk [vmem:[#allocation2 + $0x8] sm:$0xff] %vm37_vm0, %v580_v3  ;;  %40 = vst.msk [vmem:[#allocation2 + $0x10] sm:$0xff] %vm37_vm0, %v580_v3  ;;  %v648_v4 = vld [vmem:[%s800_s1 + $0x18] sm:$0xff]  ;;  %v653_v5 = vld [vmem:[%s800_s1 + $0x20] sm:$0xff] }
   0x3   :  { %v658_v6 = vld [vmem:[%s800_s1 + $0x28] sm:$0xff]  ;;  %v663_v7 = vld [vmem:[%s800_s1 + $0x30] sm:$0xff]  ;;  %v668_v8 = vld [vmem:[%s800_s1 + $0x38] sm:$0xff] }
   0x4   :  { %v673_v9 = vld [vmem:[%s800_s1 + $0x40] sm:$0xff]  ;;  %v678_v10 = vld [vmem:[%s800_s1 + $0x48] sm:$0x7] }
   0x5   :  { %v683_v11 = vld [vmem:[%s806_s2] ss:$0 sm:$0xff] }
   0x6 LB: > { %vm68_vm1 = vcmask 1042432   ;;  %v581_v12 = vmov 0.0   ;;  %vm582_vm2 = vmmov 0   ;;  %s47_s1 = smul.u32 24, %s578_s23  ;;  %vm58_vm3 = vcmask 613376   ;;  %s578_s23 = sphi %s685_s23, %s46_s23  }
   0x7   : > { %471 = vmatprep.subr.mxu0 %v581_v12  ;;  %491 = vmatprep.mubr.msk.f32.mxu0 %vm582_vm2, %v581_v12  ;;  %s173_s26 = smul.u32 40, %s578_s23  ;;  %s46_s23 = sadd.s32 1, %s578_s23  }
   0x8   : > { %472 = vmatpush3.msk.msra.mxu0 %vm68_vm1, %v678_v10  ;;  %500 = vmatprep.subr.mxu1 %v581_v12  ;;  %s48_s25 = scalar_lea.vmem %s799_s0, %s47_s1  ;;  %v170_v45 = vld [vmem:[#allocation2] sm:$0xff]  ;;  %p43_p0 = scmp.ge.s32.totalorder %s46_s23, 63  }
   0x9   : > { %473 = vmatprep.subr.mxu0 %v581_v12  ;;  %510 = vmatprep.mubr.msk.f32.mxu1 %vm582_vm2, %v581_v12  ;;  %v49_v13 = vld [vmem:[%s48_s25] sm:$0xff]  ;;  %v50_v14 = vld [vmem:[%s48_s25 + $0x8] sm:$0xff]  ;;  %v51_v15 = vld [vmem:[%s48_s25 + $0x10] sm:$0xff]  ;;  %s174_s29 = scalar_lea.vmem %s801_s3, %s173_s26  ;;  %vm583_vm7 = vmmov (%p43_p0), 0  }
   0xa   : > { %474 = vmatpush3.msra.mxu0 %v673_v9  ;;  %v179_v16 = vld [vmem:[%s174_s29 + $0x20] sm:$0xff]  ;;  %v178_v17 = vld [vmem:[%s174_s29 + $0x18] sm:$0xff]  ;;  %v177_v18 = vld [vmem:[%s174_s29 + $0x10] sm:$0xff] }
   0xb   : > { %475 = vmatprep.subr.mxu0 %v581_v12  ;;  %501 = vmatpush3.msra.mxu1 %v179_v16  ;;  %v176_v19 = vld [vmem:[%s174_s29 + $0x8] sm:$0xff]  ;;  %v175_v20 = vld [vmem:[%s174_s29] sm:$0xff]  ;;  %v172_v53 = vld [vmem:[#allocation2 + $0x10] sm:$0xff] }
   0xc   : > { %476 = vmatpush3.msra.mxu0 %v668_v8  ;;  %502 = vmatprep.subr.mxu1 %v581_v12  ;;  %v171_v49 = vld [vmem:[#allocation2 + $0x8] sm:$0xff]  ;;  %v310_v57 = vld [vmem:[%s803_s5 + $0x20] sm:$0xff] (%p43_p0)  ;;  %v309_v58 = vld [vmem:[%s803_s5 + $0x18] sm:$0xff] (%p43_p0) }
   0xd   : > { %477 = vmatprep.subr.mxu0 %v581_v12  ;;  %503 = vmatpush3.msra.mxu1 %v178_v17  ;;  %v308_v59 = vld [vmem:[%s803_s5 + $0x10] sm:$0xff] (%p43_p0)  ;;  %v434_v61 = vld [vmem:[%s802_s4] ss:$0 sm:$0xff] (%p43_p0) }
   0xe   : > { %478 = vmatpush3.msra.mxu0 %v663_v7  ;;  %504 = vmatprep.subr.mxu1 %v581_v12  ;;  %v306_v7 = vld [vmem:[%s803_s5] sm:$0xff] (%p43_p0) }
   0xf   : > { %479 = vmatprep.subr.mxu0 %v581_v12  ;;  %505 = vmatpush3.msra.mxu1 %v177_v18 }
  0x10   : > { %480 = vmatpush3.msra.mxu0 %v658_v6  ;;  %506 = vmatprep.subr.mxu1 %v581_v12 }
  0x11   : > { %481 = vmatprep.subr.mxu0 %v581_v12  ;;  %507 = vmatpush3.msra.mxu1 %v176_v19 }
  0x12   : > { %482 = vmatpush3.msra.mxu0 %v653_v5  ;;  %508 = vmatprep.subr.mxu1 %v581_v12 }
  0x13   : > { %483 = vmatprep.subr.mxu0 %v581_v12  ;;  %509 = vmatpush3.msra.mxu1 %v175_v20 }
  0x14   : > { %484 = vmatpush3.msra.mxu0 %v648_v4  ;;  %538 = vmatprep.subr.mxu1 (%p43_p0), %v580_v3  ;;  %v307_v4 = vld [vmem:[%s803_s5 + $0x8] sm:$0xff] (%p43_p0) }
  0x15   : > { %485 = vmatprep.subr.mxu0 %v581_v12 }
  0x16   : > { %486 = vmatpush3.msra.mxu0 %v637_v2 }
  0x17   : > { %487 = vmatprep.subr.mxu0 %v581_v12 }
  0x18   : > { %488 = vmatpush3.msra.mxu0 %v632_v1 }
  0x19   : > { %489 = vmatprep.subr.mxu0 %v581_v12 }
  0x1a   : > { %490 = vmatpush3.msra.mxu0 %v627_v0 }
  0x1b   : > { %492 = vmatmul.mubr.msk.f32.vlgmr.msra.gmra.mxu0 %vm58_vm3, %v49_v13  ;;  %519 = vmatprep.subr.mxu0 (%p43_p0), %v580_v3 }
  0x1c   : > { %494 = vmatprep.mubr.msk.f32.mxu0 %vm582_vm2, %v581_v12  ;;  %520 = vmatpush3.msra.mxu0 (%p43_p0), %v310_v57 }
  0x1d   :  { %521 = vmatprep.subr.mxu0 (%p43_p0), %v580_v3 }
  0x1e   :  { %522 = vmatpush3.msra.mxu0 (%p43_p0), %v309_v58 }
  0x1f   : > { %495 = vmatmul.mubr.msk.f32.gmra.mxu0 %vm58_vm3, %v50_v14  ;;  %523 = vmatprep.subr.mxu0 (%p43_p0), %v580_v3 }
  0x20   : > { %497 = vmatprep.mubr.msk.f32.mxu0 %vm582_vm2, %v581_v12  ;;  %524 = vmatpush3.msra.mxu0 (%p43_p0), %v308_v59 }
  0x21   :  { %525 = vmatprep.subr.mxu0 (%p43_p0), %v580_v3 }
  0x22   :  { %526 = vmatpush3.msra.mxu0 (%p43_p0), %v307_v4 }
  0x23   : > { %498 = vmatmul.mubr.msk.f32.gmra.mxu0 %vm58_vm3, %v51_v15  ;;  %527 = vmatprep.subr.mxu0 (%p43_p0), %v580_v3 }
  0x24   :  { %528 = vmatpush3.msra.mxu0 (%p43_p0), %v306_v7  ;;  %529 = vmatprep.mubr.msk.f32.mxu0 (%p43_p0), %vm583_vm7, %v580_v3 }
  0xdb   : > { %v138_v21 = vpop.f32.mrf.mxu0 }
  0xdc   : > { %v139_v22 = vadd.f32 %v683_v11, %v138_v21  ;;  %v438_v21 = vld [vmem:[%s804_s6] ss:$0 sm:$0xff] (%p43_p0) }
  0xdd   : > { %v493_v23 = vpop.f32.mrf.mxu0 }
  0xde   : > { %v155_v24 = vmin.f32 %v139_v22, 0.0  ;;  %vm152_vm4 = vcmp.gt.f32.partialorder %v139_v22, 0.0 }
  0xdf   : > { %v143_v25 = vpop.f32.mrf.mxu0 }
  0xe0   : > { %v158_v26 = vmul.f32 1.442695, %v155_v24  ;;  %v144_v27 = vadd.f32 %v683_v11, %v143_v25 }
  0xe1   : > { %v496_v28 = vpop.f32.mrf.mxu0 }
  0xe2   : > { %560 = vpow2.f32 %v158_v26  ;;  %v156_v29 = vmin.f32 %v144_v27, 0.0  ;;  %vm153_vm5 = vcmp.gt.f32.partialorder %v144_v27, 0.0 }
  0xe3   : > { %v148_v30 = vpop.f32.mrf.mxu0 }
  0xe4   : > { %v160_v31 = vmul.f32 1.442695, %v156_v29  ;;  %v149_v32 = vadd.f32 %v683_v11, %v148_v30 }
  0xe5   : > { %v499_v33 = vpop.f32.mrf.mxu0 }
  0xe6   : > { %562 = vpow2.f32 %v160_v31  ;;  %v157_v34 = vmin.f32 %v149_v32, 0.0  ;;  %vm154_vm6 = vcmp.gt.f32.partialorder %v149_v32, 0.0 }
  0xe8   : > { %v162_v35 = vmul.f32 1.442695, %v157_v34 }
  0xea   : > { %564 = vpow2.f32 %v162_v35 }
  0xef   : > { %v561_v36 = vpop.eup %560 }
  0xf0   : > { %v428_v37 = vadd.f32 -1.0, %v561_v36 }
  0xf2   : > { %v167_v38 = vsel %vm152_vm4, %v139_v22, %v428_v37 }
  0xf3   : > { %v563_v39 = vpop.eup %562  ;;  %511 = vmatmul.mubr.msk.f32.vlgmr.msra.gmra.mxu1 %vm37_vm0, %v167_v38 }
  0xf4   : > { %513 = vmatprep.mubr.msk.f32.mxu1 %vm582_vm2, %v581_v12  ;;  %v429_v40 = vadd.f32 -1.0, %v563_v39  ;;  %543 = vmatpush3.msra.mxu1 (%p43_p0), %v310_v57 }
  0xf5   :  { %539 = vmatprep.subr.mxu1 (%p43_p0), %v580_v3 }
  0xf6   : > { %v168_v41 = vsel %vm153_vm5, %v144_v27, %v429_v40  ;;  %544 = vmatpush3.msra.mxu1 (%p43_p0), %v309_v58 }
  0xf7   : > { %v565_v42 = vpop.eup %564  ;;  %514 = vmatmul.mubr.msk.f32.gmra.mxu1 %vm37_vm0, %v168_v41  ;;  %540 = vmatprep.subr.mxu1 (%p43_p0), %v580_v3 }
  0xf8   : > { %516 = vmatprep.mubr.msk.f32.mxu1 %vm582_vm2, %v581_v12  ;;  %v430_v43 = vadd.f32 -1.0, %v565_v42  ;;  %545 = vmatpush3.msra.mxu1 (%p43_p0), %v308_v59 }
  0xf9   :  { %541 = vmatprep.subr.mxu1 (%p43_p0), %v580_v3 }
  0xfa   : > { %v169_v44 = vsel %vm154_vm6, %v149_v32, %v430_v43  ;;  %546 = vmatpush3.msra.mxu1 (%p43_p0), %v307_v4 }
  0xfb   : > { %517 = vmatmul.mubr.msk.f32.gmra.mxu1 %vm37_vm0, %v169_v44  ;;  %542 = vmatprep.subr.mxu1 (%p43_p0), %v580_v3 }
  0xfc   :  { %532 = vmatprep.mubr.msk.f32.mxu1 (%p43_p0), %vm583_vm7, %v580_v3  ;;  %547 = vmatpush3.msra.mxu1 (%p43_p0), %v306_v7 }
 0x1b3   : > { %v255_v46 = vpop.f32.mrf.mxu1 }
 0x1b4   : > { %v269_v47 = vadd.f32 %v255_v46, %v170_v45 }
 0x1b5   : > { %v512_v48 = vpop.f32.mrf.mxu1 }
 0x1b6   : > { %272 = vst.msk [vmem:[#allocation2] sm:$0xff] %vm37_vm0, %v269_v47 }
 0x1b7   : > { %v260_v50 = vpop.f32.mrf.mxu1 }
 0x1b8   : > { %v270_v51 = vadd.f32 %v260_v50, %v171_v49 }
 0x1b9   : > { %v515_v52 = vpop.f32.mrf.mxu1 }
 0x1ba   : > { %273 = vst.msk [vmem:[#allocation2 + $0x8] sm:$0xff] %vm37_vm0, %v270_v51  ;;  %45 = sbr.rel (!%p43_p0) target bundleno = 6 (0x6), region = 57 }
 0x1bb   : > { %v265_v54 = vpop.f32.mrf.mxu1 }
 0x1bc   : > { %v271_v55 = vadd.f32 %v265_v54, %v172_v53 }
 0x1bd   : > { %v518_v56 = vpop.f32.mrf.mxu1  ;;  %v275_v62 = vld [vmem:[#allocation2] sm:$0xff] (%p43_p0) }
 0x1be   : > { %274 = vst.msk [vmem:[#allocation2 + $0x10] sm:$0xff] %vm37_vm0, %v271_v55  ;;  %v285_v1 = vadd.f32 (%p43_p0), %v434_v61, %v275_v62 }
 0x1c0   :  { %v291_v6 = vmin.f32 %v285_v1, 0.0  ;;  %vm288_vm9 = vcmp.gt.f32.partialorder %v285_v1, 0.0 }
 0x1c1   :  { %v276_v60 = vld [vmem:[#allocation2 + $0x8] sm:$0xff] }
 0x1c2   :  { %v286_v0 = vadd.f32 %v434_v61, %v276_v60  ;;  %v294_v10 = vmul.f32 1.442695, %v291_v6 }
 0x1c4   :  { %v292_v5 = vmin.f32 %v286_v0, 0.0  ;;  %vm289_vm8 = vcmp.gt.f32.partialorder %v286_v0, 0.0 }
 0x1c5   :  { %v277_v63 = vld [vmem:[#allocation2 + $0x10] sm:$0xff] }
 0x1c6   :  { %v287_v2 = vadd.f32 %v434_v61, %v277_v63  ;;  %v296_v9 = vmul.f32 1.442695, %v292_v5 }
 0x1c8   :  { %v293_v8 = vmin.f32 %v287_v2, 0.0  ;;  %566 = vpow2.f32 %v296_v9  ;;  %vm290_vm10 = vcmp.gt.f32.partialorder %v287_v2, 0.0 }
 0x1c9   :  { %568 = vpow2.f32 %v294_v10 }
 0x1ca   :  { %v298_v11 = vmul.f32 1.442695, %v293_v8 }
 0x1cc   :  { %570 = vpow2.f32 %v298_v11 }
 0x1d5   :  { %v567_v12 = vpop.eup %566 }
 0x1d6   :  { %v569_v13 = vpop.eup %568  ;;  %v436_v14 = vadd.f32 -1.0, %v567_v12 }
 0x1d7   :  { %v435_v16 = vadd.f32 -1.0, %v569_v13 }
 0x1d8   :  { %v304_v17 = vsel %vm289_vm8, %v286_v0, %v436_v14 }
 0x1d9   :  { %v571_v15 = vpop.eup %570  ;;  %533 = vmatmul.mubr.msk.f32.vlgmr.msra.gmra.mxu1 %vm37_vm0, %v304_v17  ;;  %v303_v19 = vsel %vm288_vm9, %v285_v1, %v435_v16 }
 0x1da   :  { %v437_v18 = vadd.f32 -1.0, %v571_v15  ;;  %530 = vmatmul.mubr.msk.f32.vlgmr.msra.gmra.mxu0 %vm37_vm0, %v303_v19  ;;  %535 = vmatprep.mubr.msk.f32.mxu1 %vm583_vm7, %v580_v3 }
 0x1dc   :  { %v305_v20 = vsel %vm290_vm10, %v287_v2, %v437_v18 }
 0x1dd   :  { %536 = vmatmul.mubr.msk.f32.gmra.mxu1 %vm37_vm0, %v305_v20 }
 0x299   :  { %v398_v22 = vpop.f32.mrf.mxu1 }
 0x29a   :  { %v399_v23 = vadd.f32 %v438_v21, %v398_v22  ;;  %v393_v24 = vpop.f32.mrf.mxu0 }
 0x29b   :  { %v394_v25 = vadd.f32 %v438_v21, %v393_v24  ;;  %v534_v26 = vpop.f32.mrf.mxu1 }
 0x29c   :  { %408 = vst.msk [vmem:[%s805_s7 + $0x8] sm:$0xff] %vm37_vm0, %v399_v23  ;;  %v531_v27 = vpop.f32.mrf.mxu0 }
 0x29d   :  { %407 = vst.msk [vmem:[%s805_s7] sm:$0xff] %vm37_vm0, %v394_v25  ;;  %v403_v3 = vpop.f32.mrf.mxu1 }
 0x29e   :  { %v404_v28 = vadd.f32 %v438_v21, %v403_v3 }
 0x29f   :  { %v537_v29 = vpop.f32.mrf.mxu1 }
 0x2a0   :  { %409 = vst.msk [vmem:[%s805_s7 + $0x10] sm:$0xff] %vm37_vm0, %v404_v28 }

</bundles_post_ra>
